<compile_context>
chip_gen: v5e
topology: v5e:2x2
jax: 0.10.0
libtpu: 0.0.40
codegen_flags: <defaults>
</compile_context>

<pallas_src>
import math
import functools

import jax
import jax.numpy as jnp
from jax import lax
from jax.experimental import pallas as pl
from jax.experimental.pallas import tpu as pltpu


# ----------------------------------------------------------------------------
# Kernel: one grid step == one encoder layer (layer 0 also adds the PE).
# ----------------------------------------------------------------------------
def transformer_kernel(
    x_ref, pe_ref,
    wqkv_ref, bqkv_ref, wo_ref, bo_ref,
    g1_ref, be1_ref, w1_ref, bf1_ref, w2_ref, bf2_ref, g2_ref, be2_ref,
    o_ref,
    *, num_heads,
):
    layer = pl.program_id(0)

    # Layer 0: initialize the resident activation with x + positional encoding.
    @pl.when(layer == 0)
    def _():
        o_ref[...] = (x_ref[...].astype(jnp.float32)
                      + pe_ref[...][None]).astype(o_ref.dtype)

    B, S, D = o_ref.shape
    dh = D // num_heads
    scale = 1.0 / math.sqrt(float(dh))

    # Resident activation (kept in the output VMEM buffer across the layer axis).
    x3 = o_ref[...].astype(jnp.float32)            # (B, S, D)
    x2 = x3.reshape(B * S, D)                      # (B*S, D) — denser sublanes

    # ---- fused Q|K|V projection: one (B*S, D) @ (D, 3D) matmul ----
    # TODO(synk): cast matmul operands to bf16 on v6e/v7x for more MXU
    # throughput (kept f32 here for exact parity with the f32 reference).
    wqkv = wqkv_ref[0]                             # (D, 3D)
    qkv = jnp.dot(x2, wqkv, preferred_element_type=jnp.float32) + bqkv_ref[0]
    q3 = qkv[:, 0 * D:1 * D].reshape(B, S, D)
    k3 = qkv[:, 1 * D:2 * D].reshape(B, S, D)
    v3 = qkv[:, 2 * D:3 * D].reshape(B, S, D)

    # ---- multi-head attention (mask is None), W_o folded per head ----
    wo = wo_ref[0]                                 # (D, D)
    attn = jnp.zeros((B * S, D), jnp.float32)
    for h in range(num_heads):                     # H=4, static unroll
        sl = slice(h * dh, (h + 1) * dh)
        qh = q3[:, :, sl]                          # (B, S, dh)
        kh = k3[:, :, sl]
        vh = v3[:, :, sl]
        s = jnp.einsum('bqd,bkd->bqk', qh, kh,
                       preferred_element_type=jnp.float32) * scale   # (B, S, S)
        s = s - jnp.max(s, axis=-1, keepdims=True)
        p = jnp.exp(s)
        p = p * pl.reciprocal(jnp.sum(p, axis=-1, keepdims=True), approx=True)
        pv = jnp.einsum('bqk,bkd->bqd', p, vh,
                        preferred_element_type=jnp.float32)          # (B, S, dh)
        # Fold the output projection: accumulate pv @ Wo[h-slice, :].
        attn = attn + jnp.dot(pv.reshape(B * S, dh), wo[sl, :],
                              preferred_element_type=jnp.float32)
    attn = attn + bo_ref[0]

    # TODO(synk): nn.Dropout(0.3) treated as identity (eval-mode semantics).

    # ---- residual + LayerNorm 1 ----
    y1 = x2 + attn
    mu1 = jnp.mean(y1, axis=-1, keepdims=True)
    var1 = jnp.mean((y1 - mu1) ** 2, axis=-1, keepdims=True)
    out1 = (y1 - mu1) * lax.rsqrt(var1 + 1e-5) * g1_ref[0] + be1_ref[0]

    # ---- FFN: Linear(D, 4D) -> ReLU -> Linear(4D, D) ----
    h1 = jnp.dot(out1, w1_ref[0], preferred_element_type=jnp.float32) + bf1_ref[0]
    h1 = jnp.maximum(h1, 0.0)
    ffn = jnp.dot(h1, w2_ref[0], preferred_element_type=jnp.float32) + bf2_ref[0]

    # ---- residual + LayerNorm 2 ----
    y2 = out1 + ffn
    mu2 = jnp.mean(y2, axis=-1, keepdims=True)
    var2 = jnp.mean((y2 - mu2) ** 2, axis=-1, keepdims=True)
    out2 = (y2 - mu2) * lax.rsqrt(var2 + 1e-5) * g2_ref[0] + be2_ref[0]

    o_ref[...] = out2.reshape(B, S, D).astype(o_ref.dtype)


# ----------------------------------------------------------------------------
# Wrapper: single pallas_call over the layer grid, x resident in VMEM.
# ----------------------------------------------------------------------------
def transformer_forward(src, params, num_heads):
    B, S, D = src.shape
    num_layers = params[0].shape[0]
    pe = make_positional_encoding(S, D, src.dtype)

    kernel = functools.partial(transformer_kernel, num_heads=num_heads)

    def layer_spec(arr):
        # stacked (L, r, c) weight -> one layer's (1, r, c) slab per grid step
        return pl.BlockSpec((1,) + arr.shape[1:], lambda l: (l, 0, 0))

    in_specs = (
        [pl.BlockSpec((B, S, D), lambda l: (0, 0, 0)),   # x: DMA'd once
         pl.BlockSpec((S, D), lambda l: (0, 0))]         # positional encoding
        + [layer_spec(p) for p in params]
    )
    # Output block index is constant across the layer axis -> stays resident
    # in VMEM (accumulator pattern); written back to HBM once at the end.
    out_spec = pl.BlockSpec((B, S, D), lambda l: (0, 0, 0))

    return pl.pallas_call(
        kernel,
        out_shape=jax.ShapeDtypeStruct((B, S, D), src.dtype),
        grid=(num_layers,),
        in_specs=in_specs,
        out_specs=out_spec,
        compiler_params=pltpu.CompilerParams(
            # The layer axis carries the resident-x dependency -> sequential.
            dimension_semantics=("arbitrary",),
        ),
    )(src, pe, *params)


def make_positional_encoding(seq_len, d_model, dtype=jnp.float32):
    assert d_model % 2 == 0, "sinusoidal PE assumes even d_model"
    position = jnp.arange(seq_len, dtype=jnp.float32)[:, None]              # (S, 1)
    div_term = jnp.exp(jnp.arange(0, d_model, 2, dtype=jnp.float32)
                       * (-(math.log(10000.0) / d_model)))                   # (D/2,)
    ang = position * div_term                                                # (S, D/2)
    pe = jnp.zeros((seq_len, d_model), dtype=jnp.float32)
    pe = pe.at[:, 0::2].set(jnp.sin(ang))
    pe = pe.at[:, 1::2].set(jnp.cos(ang))
    return pe.astype(dtype)


def init_params(key, num_layers, d_model):
    """Deterministic synthetic parameters mirroring the PyTorch module shapes.

    nn.Linear weights (out, in) are stored transposed (in, out); Q/K/V weights
    are pre-fused into a single (D, 3D) matrix.  Each field is stacked along a
    leading layer axis so one pallas_call can index them by grid coordinate.
    """
    d_ff = 4 * d_model
    layers = []
    for _ in range(num_layers):
        keys = jax.random.split(key, 7)
        key = keys[0]

        def lin(k, fan_in, fan_out):
            w = jax.random.normal(k, (fan_in, fan_out), jnp.float32) * 0.02
            b = jnp.zeros((1, fan_out), jnp.float32)
            return w, b

        wq, _ = lin(keys[1], d_model, d_model)
        wk, _ = lin(keys[2], d_model, d_model)
        wv, _ = lin(keys[3], d_model, d_model)
        wqkv = jnp.concatenate([wq, wk, wv], axis=1)           # (D, 3D)
        bqkv = jnp.zeros((1, 3 * d_model), jnp.float32)
        wo, bo = lin(keys[4], d_model, d_model)
        w1, bf1 = lin(keys[5], d_model, d_ff)
        w2, bf2 = lin(keys[6], d_ff, d_model)
        g1 = jnp.ones((1, d_model), jnp.float32)
        be1 = jnp.zeros((1, d_model), jnp.float32)
        g2 = jnp.ones((1, d_model), jnp.float32)
        be2 = jnp.zeros((1, d_model), jnp.float32)
        layers.append((wqkv, bqkv, wo, bo,
                       g1, be1, w1, bf1, w2, bf2, g2, be2))

    # Stack each field across layers -> tuple of (L, ...) arrays.
    return tuple(jnp.stack(field) for field in zip(*layers))


# ----------------------------------------------------------------------------
if __name__ == "__main__":
    num_layers = 2
    d_model = 32
    num_heads = 4
    B, S = 2, 8

    key = jax.random.PRNGKey(0)
    k_in, k_par = jax.random.split(key)
    src = jax.random.normal(k_in, (B, S, d_model), jnp.float32)
    params = init_params(k_par, num_layers, d_model)

    out = transformer_forward(src, params, num_heads)
    out = jax.block_until_ready(out)
    assert out.shape == (B, S, d_model)
    print("KERNEL_OK")
</pallas_src>

<mosaic_0001>
module attributes {stable_mosaic.version = 11 : i64} {
  func.func @transformer_kernel(%arg0: i32, %arg1: memref<2x8x32xf32, #tpu.memory_space<vmem>>, %arg2: memref<8x32xf32, #tpu.memory_space<vmem>>, %arg3: memref<1x32x96xf32, #tpu.memory_space<vmem>>, %arg4: memref<1x1x96xf32, #tpu.memory_space<vmem>>, %arg5: memref<1x32x32xf32, #tpu.memory_space<vmem>>, %arg6: memref<1x1x32xf32, #tpu.memory_space<vmem>>, %arg7: memref<1x1x32xf32, #tpu.memory_space<vmem>>, %arg8: memref<1x1x32xf32, #tpu.memory_space<vmem>>, %arg9: memref<1x32x128xf32, #tpu.memory_space<vmem>>, %arg10: memref<1x1x128xf32, #tpu.memory_space<vmem>>, %arg11: memref<1x128x32xf32, #tpu.memory_space<vmem>>, %arg12: memref<1x1x32xf32, #tpu.memory_space<vmem>>, %arg13: memref<1x1x32xf32, #tpu.memory_space<vmem>>, %arg14: memref<1x1x32xf32, #tpu.memory_space<vmem>>, %arg15: memref<2x8x32xf32, #tpu.memory_space<vmem>>) attributes {dimension_semantics = [#tpu.dimension_semantics<arbitrary>], iteration_bounds = array<i64: 2>, scalar_prefetch = 0 : i64, scratch_operands = 0 : i64, tpu.core_type = #tpu.core_type<tc>, window_params = [{pipeline_mode = #tpu.pipeline_mode<synchronous>, transform_indices = @transform_0, window_bounds = array<i64: 2, 8, 32>}, {pipeline_mode = #tpu.pipeline_mode<synchronous>, transform_indices = @transform_1, window_bounds = array<i64: 8, 32>}, {transform_indices = @transform_2, window_bounds = array<i64: 1, 32, 96>}, {transform_indices = @transform_3, window_bounds = array<i64: 1, 1, 96>}, {transform_indices = @transform_4, window_bounds = array<i64: 1, 32, 32>}, {transform_indices = @transform_5, window_bounds = array<i64: 1, 1, 32>}, {transform_indices = @transform_6, window_bounds = array<i64: 1, 1, 32>}, {transform_indices = @transform_7, window_bounds = array<i64: 1, 1, 32>}, {transform_indices = @transform_8, window_bounds = array<i64: 1, 32, 128>}, {transform_indices = @transform_9, window_bounds = array<i64: 1, 1, 128>}, {transform_indices = @transform_10, window_bounds = array<i64: 1, 128, 32>}, {transform_indices = @transform_11, window_bounds = array<i64: 1, 1, 32>}, {transform_indices = @transform_12, window_bounds = array<i64: 1, 1, 32>}, {transform_indices = @transform_13, window_bounds = array<i64: 1, 1, 32>}, {pipeline_mode = #tpu.pipeline_mode<synchronous>, transform_indices = @transform_14, window_bounds = array<i64: 2, 8, 32>}]} {
    %c0_i32 = arith.constant 0 : i32
    %0 = arith.cmpi eq, %arg0, %c0_i32 : i32
    %1 = arith.extui %0 : i1 to i32
    %c0_i32_0 = arith.constant 0 : i32
    %2 = arith.cmpi ne, %1, %c0_i32_0 : i32
    scf.if %2 {
      %c0_80 = arith.constant 0 : index
      %c0_81 = arith.constant 0 : index
      %c0_82 = arith.constant 0 : index
      %181 = vector.load %arg1[%c0_80, %c0_81, %c0_82] : memref<2x8x32xf32, #tpu.memory_space<vmem>>, vector<2x8x32xf32>
      %c0_83 = arith.constant 0 : index
      %c0_84 = arith.constant 0 : index
      %182 = vector.load %arg2[%c0_83, %c0_84] : memref<8x32xf32, #tpu.memory_space<vmem>>, vector<8x32xf32>
      %183 = vector.shape_cast %182 : vector<8x32xf32> to vector<1x8x32xf32>
      %184 = vector.broadcast %183 : vector<1x8x32xf32> to vector<2x8x32xf32>
      %185 = arith.addf %181, %184 : vector<2x8x32xf32>
      %c0_85 = arith.constant 0 : index
      %c0_86 = arith.constant 0 : index
      %c0_87 = arith.constant 0 : index
      %186 = vector.load %arg15[%c0_85, %c0_86, %c0_87] : memref<2x8x32xf32, #tpu.memory_space<vmem>>, vector<2x8x32xf32>
      tpu.vector_store %arg15[%c0_85, %c0_86, %c0_87], %185 {strides = array<i32>} : memref<2x8x32xf32, #tpu.memory_space<vmem>>, vector<2x8x32xf32>,
    } else {
    }
    %c0 = arith.constant 0 : index
    %c0_1 = arith.constant 0 : index
    %c0_2 = arith.constant 0 : index
    %3 = vector.load %arg15[%c0, %c0_1, %c0_2] : memref<2x8x32xf32, #tpu.memory_space<vmem>>, vector<2x8x32xf32>
    %4 = vector.shape_cast %3 : vector<2x8x32xf32> to vector<16x32xf32>
    %c0_3 = arith.constant 0 : index
    %c0_4 = arith.constant 0 : index
    %c0_5 = arith.constant 0 : index
    %5 = vector.load %arg3[%c0_3, %c0_4, %c0_5] : memref<1x32x96xf32, #tpu.memory_space<vmem>>, vector<1x32x96xf32>
    %6 = vector.shape_cast %5 : vector<1x32x96xf32> to vector<32x96xf32>
    %cst = arith.constant dense<0.000000e+00> : vector<16x96xf32>
    %7 = tpu.matmul %4, %6, %cst {dimension_numbers = #tpu.dot_dimension_numbers<[1], [0], [0], [1], [0, 0, 1, 1], [], []>} : vector<16x32xf32>, vector<32x96xf32>, vector<16x96xf32> -> vector<16x96xf32>
    %c0_6 = arith.constant 0 : index
    %c0_7 = arith.constant 0 : index
    %c0_8 = arith.constant 0 : index
    %8 = vector.load %arg4[%c0_6, %c0_7, %c0_8] : memref<1x1x96xf32, #tpu.memory_space<vmem>>, vector<1x1x96xf32>
    %9 = vector.shape_cast %8 : vector<1x1x96xf32> to vector<1x96xf32>
    %10 = vector.broadcast %9 : vector<1x96xf32> to vector<16x96xf32>
    %11 = arith.addf %7, %10 : vector<16x96xf32>
    %12 = vector.extract_strided_slice %11 {offsets = [0, 0], sizes = [16, 32], strides = [1, 1]} : vector<16x96xf32> to vector<16x32xf32>
    %13 = vector.shape_cast %12 : vector<16x32xf32> to vector<2x8x32xf32>
    %14 = vector.extract_strided_slice %11 {offsets = [0, 32], sizes = [16, 32], strides = [1, 1]} : vector<16x96xf32> to vector<16x32xf32>
    %15 = vector.shape_cast %14 : vector<16x32xf32> to vector<2x8x32xf32>
    %16 = vector.extract_strided_slice %11 {offsets = [0, 64], sizes = [16, 32], strides = [1, 1]} : vector<16x96xf32> to vector<16x32xf32>
    %17 = vector.shape_cast %16 : vector<16x32xf32> to vector<2x8x32xf32>
    %c0_9 = arith.constant 0 : index
    %c0_10 = arith.constant 0 : index
    %c0_11 = arith.constant 0 : index
    %18 = vector.load %arg5[%c0_9, %c0_10, %c0_11] : memref<1x32x32xf32, #tpu.memory_space<vmem>>, vector<1x32x32xf32>
    %19 = vector.shape_cast %18 : vector<1x32x32xf32> to vector<32x32xf32>
    %cst_12 = arith.constant 0.000000e+00 : f32
    %20 = vector.broadcast %cst_12 : f32 to vector<16x32xf32>
    %21 = vector.extract_strided_slice %13 {offsets = [0, 0, 0], sizes = [2, 8, 8], strides = [1, 1, 1]} : vector<2x8x32xf32> to vector<2x8x8xf32>
    %22 = vector.extract_strided_slice %15 {offsets = [0, 0, 0], sizes = [2, 8, 8], strides = [1, 1, 1]} : vector<2x8x32xf32> to vector<2x8x8xf32>
    %23 = vector.extract_strided_slice %17 {offsets = [0, 0, 0], sizes = [2, 8, 8], strides = [1, 1, 1]} : vector<2x8x32xf32> to vector<2x8x8xf32>
    "tpu.trace_start"() <{level = 10 : i32, message = "bqd,bkd->bqk"}> : () -> ()
    %cst_13 = arith.constant dense<0.000000e+00> : vector<2x8x8xf32>
    %24 = tpu.matmul %21, %22, %cst_13 {dimension_numbers = #tpu.dot_dimension_numbers<[2], [2], [1], [1], [0, 0, 0, 1, 1, 1], [0], [0]>} : vector<2x8x8xf32>, vector<2x8x8xf32>, vector<2x8x8xf32> -> vector<2x8x8xf32>
    "tpu.trace_stop"() : () -> ()
    %cst_14 = arith.constant 0.353553385 : f32
    %25 = vector.broadcast %cst_14 : f32 to vector<2x8x8xf32>
    %26 = arith.mulf %24, %25 : vector<2x8x8xf32>
    %cst_15 = arith.constant dense<0xFF800000> : vector<2x8xf32>
    %27 = vector.multi_reduction <maximumf>, %26, %cst_15 [2] : vector<2x8x8xf32> to vector<2x8xf32>
    %28 = vector.shape_cast %27 : vector<2x8xf32> to vector<2x8x1xf32>
    %29 = vector.broadcast %28 : vector<2x8x1xf32> to vector<2x8x8xf32>
    %30 = arith.subf %26, %29 : vector<2x8x8xf32>
    %31 = math.exp %30 : vector<2x8x8xf32>
    %cst_16 = arith.constant dense<0.000000e+00> : vector<2x8xf32>
    %32 = vector.multi_reduction <add>, %31, %cst_16 [2] : vector<2x8x8xf32> to vector<2x8xf32>
    %33 = vector.shape_cast %32 : vector<2x8xf32> to vector<2x8x1xf32>
    %34 = tpu.reciprocal %33 {approx = true} : vector<2x8x1xf32> -> vector<2x8x1xf32>
    %35 = vector.broadcast %34 : vector<2x8x1xf32> to vector<2x8x8xf32>
    %36 = arith.mulf %31, %35 : vector<2x8x8xf32>
    "tpu.trace_start"() <{level = 10 : i32, message = "bqk,bkd->bqd"}> : () -> ()
    %cst_17 = arith.constant dense<0.000000e+00> : vector<2x8x8xf32>
    %37 = tpu.matmul %36, %23, %cst_17 {dimension_numbers = #tpu.dot_dimension_numbers<[2], [1], [1], [2], [0, 0, 0, 1, 1, 2], [0], [0]>} : vector<2x8x8xf32>, vector<2x8x8xf32>, vector<2x8x8xf32> -> vector<2x8x8xf32>
    "tpu.trace_stop"() : () -> ()
    %38 = vector.shape_cast %37 : vector<2x8x8xf32> to vector<16x8xf32>
    %39 = vector.extract_strided_slice %19 {offsets = [0, 0], sizes = [8, 32], strides = [1, 1]} : vector<32x32xf32> to vector<8x32xf32>
    %cst_18 = arith.constant dense<0.000000e+00> : vector<16x32xf32>
    %40 = tpu.matmul %38, %39, %cst_18 {dimension_numbers = #tpu.dot_dimension_numbers<[1], [0], [0], [1], [0, 0, 1, 1], [], []>} : vector<16x8xf32>, vector<8x32xf32>, vector<16x32xf32> -> vector<16x32xf32>
    %41 = arith.addf %20, %40 : vector<16x32xf32>
    %42 = vector.extract_strided_slice %13 {offsets = [0, 0, 8], sizes = [2, 8, 8], strides = [1, 1, 1]} : vector<2x8x32xf32> to vector<2x8x8xf32>
    %43 = vector.extract_strided_slice %15 {offsets = [0, 0, 8], sizes = [2, 8, 8], strides = [1, 1, 1]} : vector<2x8x32xf32> to vector<2x8x8xf32>
    %44 = vector.extract_strided_slice %17 {offsets = [0, 0, 8], sizes = [2, 8, 8], strides = [1, 1, 1]} : vector<2x8x32xf32> to vector<2x8x8xf32>
    "tpu.trace_start"() <{level = 10 : i32, message = "bqd,bkd->bqk"}> : () -> ()
    %cst_19 = arith.constant dense<0.000000e+00> : vector<2x8x8xf32>
    %45 = tpu.matmul %42, %43, %cst_19 {dimension_numbers = #tpu.dot_dimension_numbers<[2], [2], [1], [1], [0, 0, 0, 1, 1, 1], [0], [0]>} : vector<2x8x8xf32>, vector<2x8x8xf32>, vector<2x8x8xf32> -> vector<2x8x8xf32>
    "tpu.trace_stop"() : () -> ()
    %cst_20 = arith.constant 0.353553385 : f32
    %46 = vector.broadcast %cst_20 : f32 to vector<2x8x8xf32>
    %47 = arith.mulf %45, %46 : vector<2x8x8xf32>
    %cst_21 = arith.constant dense<0xFF800000> : vector<2x8xf32>
    %48 = vector.multi_reduction <maximumf>, %47, %cst_21 [2] : vector<2x8x8xf32> to vector<2x8xf32>
    %49 = vector.shape_cast %48 : vector<2x8xf32> to vector<2x8x1xf32>
    %50 = vector.broadcast %49 : vector<2x8x1xf32> to vector<2x8x8xf32>
    %51 = arith.subf %47, %50 : vector<2x8x8xf32>
    %52 = math.exp %51 : vector<2x8x8xf32>
    %cst_22 = arith.constant dense<0.000000e+00> : vector<2x8xf32>
    %53 = vector.multi_reduction <add>, %52, %cst_22 [2] : vector<2x8x8xf32> to vector<2x8xf32>
    %54 = vector.shape_cast %53 : vector<2x8xf32> to vector<2x8x1xf32>
    %55 = tpu.reciprocal %54 {approx = true} : vector<2x8x1xf32> -> vector<2x8x1xf32>
    %56 = vector.broadcast %55 : vector<2x8x1xf32> to vector<2x8x8xf32>
    %57 = arith.mulf %52, %56 : vector<2x8x8xf32>
    "tpu.trace_start"() <{level = 10 : i32, message = "bqk,bkd->bqd"}> : () -> ()
    %cst_23 = arith.constant dense<0.000000e+00> : vector<2x8x8xf32>
    %58 = tpu.matmul %57, %44, %cst_23 {dimension_numbers = #tpu.dot_dimension_numbers<[2], [1], [1], [2], [0, 0, 0, 1, 1, 2], [0], [0]>} : vector<2x8x8xf32>, vector<2x8x8xf32>, vector<2x8x8xf32> -> vector<2x8x8xf32>
    "tpu.trace_stop"() : () -> ()
    %59 = vector.shape_cast %58 : vector<2x8x8xf32> to vector<16x8xf32>
    %60 = vector.extract_strided_slice %19 {offsets = [8, 0], sizes = [8, 32], strides = [1, 1]} : vector<32x32xf32> to vector<8x32xf32>
    %cst_24 = arith.constant dense<0.000000e+00> : vector<16x32xf32>
    %61 = tpu.matmul %59, %60, %cst_24 {dimension_numbers = #tpu.dot_dimension_numbers<[1], [0], [0], [1], [0, 0, 1, 1], [], []>} : vector<16x8xf32>, vector<8x32xf32>, vector<16x32xf32> -> vector<16x32xf32>
    %62 = arith.addf %41, %61 : vector<16x32xf32>
    %63 = vector.extract_strided_slice %13 {offsets = [0, 0, 16], sizes = [2, 8, 8], strides = [1, 1, 1]} : vector<2x8x32xf32> to vector<2x8x8xf32>
    %64 = vector.extract_strided_slice %15 {offsets = [0, 0, 16], sizes = [2, 8, 8], strides = [1, 1, 1]} : vector<2x8x32xf32> to vector<2x8x8xf32>
    %65 = vector.extract_strided_slice %17 {offsets = [0, 0, 16], sizes = [2, 8, 8], strides = [1, 1, 1]} : vector<2x8x32xf32> to vector<2x8x8xf32>
    "tpu.trace_start"() <{level = 10 : i32, message = "bqd,bkd->bqk"}> : () -> ()
    %cst_25 = arith.constant dense<0.000000e+00> : vector<2x8x8xf32>
    %66 = tpu.matmul %63, %64, %cst_25 {dimension_numbers = #tpu.dot_dimension_numbers<[2], [2], [1], [1], [0, 0, 0, 1, 1, 1], [0], [0]>} : vector<2x8x8xf32>, vector<2x8x8xf32>, vector<2x8x8xf32> -> vector<2x8x8xf32>
    "tpu.trace_stop"() : () -> ()
    %cst_26 = arith.constant 0.353553385 : f32
    %67 = vector.broadcast %cst_26 : f32 to vector<2x8x8xf32>
    %68 = arith.mulf %66, %67 : vector<2x8x8xf32>
    %cst_27 = arith.constant dense<0xFF800000> : vector<2x8xf32>
    %69 = vector.multi_reduction <maximumf>, %68, %cst_27 [2] : vector<2x8x8xf32> to vector<2x8xf32>
    %70 = vector.shape_cast %69 : vector<2x8xf32> to vector<2x8x1xf32>
    %71 = vector.broadcast %70 : vector<2x8x1xf32> to vector<2x8x8xf32>
    %72 = arith.subf %68, %71 : vector<2x8x8xf32>
    %73 = math.exp %72 : vector<2x8x8xf32>
    %cst_28 = arith.constant dense<0.000000e+00> : vector<2x8xf32>
    %74 = vector.multi_reduction <add>, %73, %cst_28 [2] : vector<2x8x8xf32> to vector<2x8xf32>
    %75 = vector.shape_cast %74 : vector<2x8xf32> to vector<2x8x1xf32>
    %76 = tpu.reciprocal %75 {approx = true} : vector<2x8x1xf32> -> vector<2x8x1xf32>
    %77 = vector.broadcast %76 : vector<2x8x1xf32> to vector<2x8x8xf32>
    %78 = arith.mulf %73, %77 : vector<2x8x8xf32>
    "tpu.trace_start"() <{level = 10 : i32, message = "bqk,bkd->bqd"}> : () -> ()
    %cst_29 = arith.constant dense<0.000000e+00> : vector<2x8x8xf32>
    %79 = tpu.matmul %78, %65, %cst_29 {dimension_numbers = #tpu.dot_dimension_numbers<[2], [1], [1], [2], [0, 0, 0, 1, 1, 2], [0], [0]>} : vector<2x8x8xf32>, vector<2x8x8xf32>, vector<2x8x8xf32> -> vector<2x8x8xf32>
    "tpu.trace_stop"() : () -> ()
    %80 = vector.shape_cast %79 : vector<2x8x8xf32> to vector<16x8xf32>
    %81 = vector.extract_strided_slice %19 {offsets = [16, 0], sizes = [8, 32], strides = [1, 1]} : vector<32x32xf32> to vector<8x32xf32>
    %cst_30 = arith.constant dense<0.000000e+00> : vector<16x32xf32>
    %82 = tpu.matmul %80, %81, %cst_30 {dimension_numbers = #tpu.dot_dimension_numbers<[1], [0], [0], [1], [0, 0, 1, 1], [], []>} : vector<16x8xf32>, vector<8x32xf32>, vector<16x32xf32> -> vector<16x32xf32>
    %83 = arith.addf %62, %82 : vector<16x32xf32>
    %84 = vector.extract_strided_slice %13 {offsets = [0, 0, 24], sizes = [2, 8, 8], strides = [1, 1, 1]} : vector<2x8x32xf32> to vector<2x8x8xf32>
    %85 = vector.extract_strided_slice %15 {offsets = [0, 0, 24], sizes = [2, 8, 8], strides = [1, 1, 1]} : vector<2x8x32xf32> to vector<2x8x8xf32>
    %86 = vector.extract_strided_slice %17 {offsets = [0, 0, 24], sizes = [2, 8, 8], strides = [1, 1, 1]} : vector<2x8x32xf32> to vector<2x8x8xf32>
    "tpu.trace_start"() <{level = 10 : i32, message = "bqd,bkd->bqk"}> : () -> ()
    %cst_31 = arith.constant dense<0.000000e+00> : vector<2x8x8xf32>
    %87 = tpu.matmul %84, %85, %cst_31 {dimension_numbers = #tpu.dot_dimension_numbers<[2], [2], [1], [1], [0, 0, 0, 1, 1, 1], [0], [0]>} : vector<2x8x8xf32>, vector<2x8x8xf32>, vector<2x8x8xf32> -> vector<2x8x8xf32>
    "tpu.trace_stop"() : () -> ()
    %cst_32 = arith.constant 0.353553385 : f32
    %88 = vector.broadcast %cst_32 : f32 to vector<2x8x8xf32>
    %89 = arith.mulf %87, %88 : vector<2x8x8xf32>
    %cst_33 = arith.constant dense<0xFF800000> : vector<2x8xf32>
    %90 = vector.multi_reduction <maximumf>, %89, %cst_33 [2] : vector<2x8x8xf32> to vector<2x8xf32>
    %91 = vector.shape_cast %90 : vector<2x8xf32> to vector<2x8x1xf32>
    %92 = vector.broadcast %91 : vector<2x8x1xf32> to vector<2x8x8xf32>
    %93 = arith.subf %89, %92 : vector<2x8x8xf32>
    %94 = math.exp %93 : vector<2x8x8xf32>
    %cst_34 = arith.constant dense<0.000000e+00> : vector<2x8xf32>
    %95 = vector.multi_reduction <add>, %94, %cst_34 [2] : vector<2x8x8xf32> to vector<2x8xf32>
    %96 = vector.shape_cast %95 : vector<2x8xf32> to vector<2x8x1xf32>
    %97 = tpu.reciprocal %96 {approx = true} : vector<2x8x1xf32> -> vector<2x8x1xf32>
    %98 = vector.broadcast %97 : vector<2x8x1xf32> to vector<2x8x8xf32>
    %99 = arith.mulf %94, %98 : vector<2x8x8xf32>
    "tpu.trace_start"() <{level = 10 : i32, message = "bqk,bkd->bqd"}> : () -> ()
    %cst_35 = arith.constant dense<0.000000e+00> : vector<2x8x8xf32>
    %100 = tpu.matmul %99, %86, %cst_35 {dimension_numbers = #tpu.dot_dimension_numbers<[2], [1], [1], [2], [0, 0, 0, 1, 1, 2], [0], [0]>} : vector<2x8x8xf32>, vector<2x8x8xf32>, vector<2x8x8xf32> -> vector<2x8x8xf32>
    "tpu.trace_stop"() : () -> ()
    %101 = vector.shape_cast %100 : vector<2x8x8xf32> to vector<16x8xf32>
    %102 = vector.extract_strided_slice %19 {offsets = [24, 0], sizes = [8, 32], strides = [1, 1]} : vector<32x32xf32> to vector<8x32xf32>
    %cst_36 = arith.constant dense<0.000000e+00> : vector<16x32xf32>
    %103 = tpu.matmul %101, %102, %cst_36 {dimension_numbers = #tpu.dot_dimension_numbers<[1], [0], [0], [1], [0, 0, 1, 1], [], []>} : vector<16x8xf32>, vector<8x32xf32>, vector<16x32xf32> -> vector<16x32xf32>
    %104 = arith.addf %83, %103 : vector<16x32xf32>
    %c0_37 = arith.constant 0 : index
    %c0_38 = arith.constant 0 : index
    %c0_39 = arith.constant 0 : index
    %105 = vector.load %arg6[%c0_37, %c0_38, %c0_39] : memref<1x1x32xf32, #tpu.memory_space<vmem>>, vector<1x1x32xf32>
    %106 = vector.shape_cast %105 : vector<1x1x32xf32> to vector<1x32xf32>
    %107 = vector.broadcast %106 : vector<1x32xf32> to vector<16x32xf32>
    %108 = arith.addf %104, %107 : vector<16x32xf32>
    %109 = arith.addf %4, %108 : vector<16x32xf32>
    %cst_40 = arith.constant dense<0.000000e+00> : vector<16xf32>
    %110 = vector.multi_reduction <add>, %109, %cst_40 [1] : vector<16x32xf32> to vector<16xf32>
    %111 = vector.shape_cast %110 : vector<16xf32> to vector<16x1xf32>
    %cst_41 = arith.constant 3.200000e+01 : f32
    %112 = vector.broadcast %cst_41 : f32 to vector<16x1xf32>
    %113 = arith.divf %111, %112 : vector<16x1xf32>
    %114 = vector.broadcast %113 : vector<16x1xf32> to vector<16x32xf32>
    %115 = arith.subf %109, %114 : vector<16x32xf32>
    %116 = arith.mulf %115, %115 : vector<16x32xf32>
    %cst_42 = arith.constant dense<0.000000e+00> : vector<16xf32>
    %117 = vector.multi_reduction <add>, %116, %cst_42 [1] : vector<16x32xf32> to vector<16xf32>
    %118 = vector.shape_cast %117 : vector<16xf32> to vector<16x1xf32>
    %cst_43 = arith.constant 3.200000e+01 : f32
    %119 = vector.broadcast %cst_43 : f32 to vector<16x1xf32>
    %120 = arith.divf %118, %119 : vector<16x1xf32>
    %121 = vector.broadcast %113 : vector<16x1xf32> to vector<16x32xf32>
    %122 = arith.subf %109, %121 : vector<16x32xf32>
    %cst_44 = arith.constant 9.99999974E-6 : f32
    %123 = vector.broadcast %cst_44 : f32 to vector<16x1xf32>
    %124 = arith.addf %120, %123 : vector<16x1xf32>
    %125 = math.rsqrt %124 : vector<16x1xf32>
    %126 = vector.broadcast %125 : vector<16x1xf32> to vector<16x32xf32>
    %127 = arith.mulf %122, %126 : vector<16x32xf32>
    %c0_45 = arith.constant 0 : index
    %c0_46 = arith.constant 0 : index
    %c0_47 = arith.constant 0 : index
    %128 = vector.load %arg7[%c0_45, %c0_46, %c0_47] : memref<1x1x32xf32, #tpu.memory_space<vmem>>, vector<1x1x32xf32>
    %129 = vector.shape_cast %128 : vector<1x1x32xf32> to vector<1x32xf32>
    %130 = vector.broadcast %129 : vector<1x32xf32> to vector<16x32xf32>
    %131 = arith.mulf %127, %130 : vector<16x32xf32>
    %c0_48 = arith.constant 0 : index
    %c0_49 = arith.constant 0 : index
    %c0_50 = arith.constant 0 : index
    %132 = vector.load %arg8[%c0_48, %c0_49, %c0_50] : memref<1x1x32xf32, #tpu.memory_space<vmem>>, vector<1x1x32xf32>
    %133 = vector.shape_cast %132 : vector<1x1x32xf32> to vector<1x32xf32>
    %134 = vector.broadcast %133 : vector<1x32xf32> to vector<16x32xf32>
    %135 = arith.addf %131, %134 : vector<16x32xf32>
    %c0_51 = arith.constant 0 : index
    %c0_52 = arith.constant 0 : index
    %c0_53 = arith.constant 0 : index
    %136 = vector.load %arg9[%c0_51, %c0_52, %c0_53] : memref<1x32x128xf32, #tpu.memory_space<vmem>>, vector<1x32x128xf32>
    %137 = vector.shape_cast %136 : vector<1x32x128xf32> to vector<32x128xf32>
    %cst_54 = arith.constant dense<0.000000e+00> : vector<16x128xf32>
    %138 = tpu.matmul %135, %137, %cst_54 {dimension_numbers = #tpu.dot_dimension_numbers<[1], [0], [0], [1], [0, 0, 1, 1], [], []>} : vector<16x32xf32>, vector<32x128xf32>, vector<16x128xf32> -> vector<16x128xf32>
    %c0_55 = arith.constant 0 : index
    %c0_56 = arith.constant 0 : index
    %c0_57 = arith.constant 0 : index
    %139 = vector.load %arg10[%c0_55, %c0_56, %c0_57] : memref<1x1x128xf32, #tpu.memory_space<vmem>>, vector<1x1x128xf32>
    %140 = vector.shape_cast %139 : vector<1x1x128xf32> to vector<1x128xf32>
    %141 = vector.broadcast %140 : vector<1x128xf32> to vector<16x128xf32>
    %142 = arith.addf %138, %141 : vector<16x128xf32>
    %cst_58 = arith.constant 0.000000e+00 : f32
    %143 = vector.broadcast %cst_58 : f32 to vector<16x128xf32>
    %144 = arith.maximumf %142, %143 : vector<16x128xf32>
    %c0_59 = arith.constant 0 : index
    %c0_60 = arith.constant 0 : index
    %c0_61 = arith.constant 0 : index
    %145 = vector.load %arg11[%c0_59, %c0_60, %c0_61] : memref<1x128x32xf32, #tpu.memory_space<vmem>>, vector<1x128x32xf32>
    %146 = vector.shape_cast %145 : vector<1x128x32xf32> to vector<128x32xf32>
    %cst_62 = arith.constant dense<0.000000e+00> : vector<16x32xf32>
    %147 = tpu.matmul %144, %146, %cst_62 {dimension_numbers = #tpu.dot_dimension_numbers<[1], [0], [0], [1], [0, 0, 1, 1], [], []>} : vector<16x128xf32>, vector<128x32xf32>, vector<16x32xf32> -> vector<16x32xf32>
    %c0_63 = arith.constant 0 : index
    %c0_64 = arith.constant 0 : index
    %c0_65 = arith.constant 0 : index
    %148 = vector.load %arg12[%c0_63, %c0_64, %c0_65] : memref<1x1x32xf32, #tpu.memory_space<vmem>>, vector<1x1x32xf32>
    %149 = vector.shape_cast %148 : vector<1x1x32xf32> to vector<1x32xf32>
    %150 = vector.broadcast %149 : vector<1x32xf32> to vector<16x32xf32>
    %151 = arith.addf %147, %150 : vector<16x32xf32>
    %152 = arith.addf %135, %151 : vector<16x32xf32>
    %cst_66 = arith.constant dense<0.000000e+00> : vector<16xf32>
    %153 = vector.multi_reduction <add>, %152, %cst_66 [1] : vector<16x32xf32> to vector<16xf32>
    %154 = vector.shape_cast %153 : vector<16xf32> to vector<16x1xf32>
    %cst_67 = arith.constant 3.200000e+01 : f32
    %155 = vector.broadcast %cst_67 : f32 to vector<16x1xf32>
    %156 = arith.divf %154, %155 : vector<16x1xf32>
    %157 = vector.broadcast %156 : vector<16x1xf32> to vector<16x32xf32>
    %158 = arith.subf %152, %157 : vector<16x32xf32>
    %159 = arith.mulf %158, %158 : vector<16x32xf32>
    %cst_68 = arith.constant dense<0.000000e+00> : vector<16xf32>
    %160 = vector.multi_reduction <add>, %159, %cst_68 [1] : vector<16x32xf32> to vector<16xf32>
    %161 = vector.shape_cast %160 : vector<16xf32> to vector<16x1xf32>
    %cst_69 = arith.constant 3.200000e+01 : f32
    %162 = vector.broadcast %cst_69 : f32 to vector<16x1xf32>
    %163 = arith.divf %161, %162 : vector<16x1xf32>
    %164 = vector.broadcast %156 : vector<16x1xf32> to vector<16x32xf32>
    %165 = arith.subf %152, %164 : vector<16x32xf32>
    %cst_70 = arith.constant 9.99999974E-6 : f32
    %166 = vector.broadcast %cst_70 : f32 to vector<16x1xf32>
    %167 = arith.addf %163, %166 : vector<16x1xf32>
    %168 = math.rsqrt %167 : vector<16x1xf32>
    %169 = vector.broadcast %168 : vector<16x1xf32> to vector<16x32xf32>
    %170 = arith.mulf %165, %169 : vector<16x32xf32>
    %c0_71 = arith.constant 0 : index
    %c0_72 = arith.constant 0 : index
    %c0_73 = arith.constant 0 : index
    %171 = vector.load %arg13[%c0_71, %c0_72, %c0_73] : memref<1x1x32xf32, #tpu.memory_space<vmem>>, vector<1x1x32xf32>
    %172 = vector.shape_cast %171 : vector<1x1x32xf32> to vector<1x32xf32>
    %173 = vector.broadcast %172 : vector<1x32xf32> to vector<16x32xf32>
    %174 = arith.mulf %170, %173 : vector<16x32xf32>
    %c0_74 = arith.constant 0 : index
    %c0_75 = arith.constant 0 : index
    %c0_76 = arith.constant 0 : index
    %175 = vector.load %arg14[%c0_74, %c0_75, %c0_76] : memref<1x1x32xf32, #tpu.memory_space<vmem>>, vector<1x1x32xf32>
    %176 = vector.shape_cast %175 : vector<1x1x32xf32> to vector<1x32xf32>
    %177 = vector.broadcast %176 : vector<1x32xf32> to vector<16x32xf32>
    %178 = arith.addf %174, %177 : vector<16x32xf32>
    %179 = vector.shape_cast %178 : vector<16x32xf32> to vector<2x8x32xf32>
    %c0_77 = arith.constant 0 : index
    %c0_78 = arith.constant 0 : index
    %c0_79 = arith.constant 0 : index
    %180 = vector.load %arg15[%c0_77, %c0_78, %c0_79] : memref<2x8x32xf32, #tpu.memory_space<vmem>>, vector<2x8x32xf32>
    tpu.vector_store %arg15[%c0_77, %c0_78, %c0_79], %179 {strides = array<i32>} : memref<2x8x32xf32, #tpu.memory_space<vmem>>, vector<2x8x32xf32>,
    return
  }
  func.func @transform_0(%arg0: i32) -> (i32, i32, i32) {
    %c0_i32 = arith.constant 0 : i32
    %c0_i32_0 = arith.constant 0 : i32
    %c0_i32_1 = arith.constant 0 : i32
    %c0_i32_2 = arith.constant 0 : i32
    return %c0_i32, %c0_i32_0, %c0_i32_1 : i32, i32, i32
  }
  func.func @transform_1(%arg0: i32) -> (i32, i32) {
    %c0_i32 = arith.constant 0 : i32
    %c0_i32_0 = arith.constant 0 : i32
    %c0_i32_1 = arith.constant 0 : i32
    return %c0_i32, %c0_i32_0 : i32, i32
  }
  func.func @transform_2(%arg0: i32) -> (i32, i32, i32) {
    %c0_i32 = arith.constant 0 : i32
    %c0_i32_0 = arith.constant 0 : i32
    %c0_i32_1 = arith.constant 0 : i32
    return %arg0, %c0_i32, %c0_i32_0 : i32, i32, i32
  }
  func.func @transform_3(%arg0: i32) -> (i32, i32, i32) {
    %c0_i32 = arith.constant 0 : i32
    %c0_i32_0 = arith.constant 0 : i32
    %c0_i32_1 = arith.constant 0 : i32
    return %arg0, %c0_i32, %c0_i32_0 : i32, i32, i32
  }
  func.func @transform_4(%arg0: i32) -> (i32, i32, i32) {
    %c0_i32 = arith.constant 0 : i32
    %c0_i32_0 = arith.constant 0 : i32
    %c0_i32_1 = arith.constant 0 : i32
    return %arg0, %c0_i32, %c0_i32_0 : i32, i32, i32
  }
  func.func @transform_5(%arg0: i32) -> (i32, i32, i32) {
    %c0_i32 = arith.constant 0 : i32
    %c0_i32_0 = arith.constant 0 : i32
    %c0_i32_1 = arith.constant 0 : i32
    return %arg0, %c0_i32, %c0_i32_0 : i32, i32, i32
  }
  func.func @transform_6(%arg0: i32) -> (i32, i32, i32) {
    %c0_i32 = arith.constant 0 : i32
    %c0_i32_0 = arith.constant 0 : i32
    %c0_i32_1 = arith.constant 0 : i32
    return %arg0, %c0_i32, %c0_i32_0 : i32, i32, i32
  }
  func.func @transform_7(%arg0: i32) -> (i32, i32, i32) {
    %c0_i32 = arith.constant 0 : i32
    %c0_i32_0 = arith.constant 0 : i32
    %c0_i32_1 = arith.constant 0 : i32
    return %arg0, %c0_i32, %c0_i32_0 : i32, i32, i32
  }
  func.func @transform_8(%arg0: i32) -> (i32, i32, i32) {
    %c0_i32 = arith.constant 0 : i32
    %c0_i32_0 = arith.constant 0 : i32
    %c0_i32_1 = arith.constant 0 : i32
    return %arg0, %c0_i32, %c0_i32_0 : i32, i32, i32
  }
  func.func @transform_9(%arg0: i32) -> (i32, i32, i32) {
    %c0_i32 = arith.constant 0 : i32
    %c0_i32_0 = arith.constant 0 : i32
    %c0_i32_1 = arith.constant 0 : i32
    return %arg0, %c0_i32, %c0_i32_0 : i32, i32, i32
  }
  func.func @transform_10(%arg0: i32) -> (i32, i32, i32) {
    %c0_i32 = arith.constant 0 : i32
    %c0_i32_0 = arith.constant 0 : i32
    %c0_i32_1 = arith.constant 0 : i32
    return %arg0, %c0_i32, %c0_i32_0 : i32, i32, i32
  }
  func.func @transform_11(%arg0: i32) -> (i32, i32, i32) {
    %c0_i32 = arith.constant 0 : i32
    %c0_i32_0 = arith.constant 0 : i32
    %c0_i32_1 = arith.constant 0 : i32
    return %arg0, %c0_i32, %c0_i32_0 : i32, i32, i32
  }
  func.func @transform_12(%arg0: i32) -> (i32, i32, i32) {
    %c0_i32 = arith.constant 0 : i32
    %c0_i32_0 = arith.constant 0 : i32
    %c0_i32_1 = arith.constant 0 : i32
    return %arg0, %c0_i32, %c0_i32_0 : i32, i32, i32
  }
  func.func @transform_13(%arg0: i32) -> (i32, i32, i32) {
    %c0_i32 = arith.constant 0 : i32
    %c0_i32_0 = arith.constant 0 : i32
    %c0_i32_1 = arith.constant 0 : i32
    return %arg0, %c0_i32, %c0_i32_0 : i32, i32, i32
  }
  func.func @transform_14(%arg0: i32) -> (i32, i32, i32) {
    %c0_i32 = arith.constant 0 : i32
    %c0_i32_0 = arith.constant 0 : i32
    %c0_i32_1 = arith.constant 0 : i32
    %c0_i32_2 = arith.constant 0 : i32
    return %c0_i32, %c0_i32_0, %c0_i32_1 : i32, i32, i32
  }
}

</mosaic_0001>

<bundles_post_ra>
// kernel: tpu_custom_call.1
= control target key start
LH: loop header
LB: loop body
LE: loop exit
PB: predicated region body
PF: predicated region fallthrough
CT: control target
= control target key end

     0   :  { %s2239_s0 = inlined_call_operand.vmem [shape: f32[2,8,32], index: 0, kind: input, shape index: {}]   ;;  %s2240_s1 = inlined_call_operand.vmem [shape: f32[8,32], index: 1, kind: input, shape index: {}]   ;;  %s2241_s2 = inlined_call_operand.vmem [shape: f32[2,32,96], index: 2, kind: input, shape index: {}]   ;;  %s2242_s3 = inlined_call_operand.vmem [shape: f32[2,1,96], index: 3, kind: input, shape index: {}]   ;;  %s2243_s4 = inlined_call_operand.vmem [shape: f32[2,32,32], index: 4, kind: input, shape index: {}]   ;;  %s2244_s5 = inlined_call_operand.vmem [shape: f32[2,1,32], index: 5, kind: input, shape index: {}]   ;;  %s2245_s6 = inlined_call_operand.vmem [shape: f32[2,1,32], index: 6, kind: input, shape index: {}]   ;;  %s2246_s7 = inlined_call_operand.vmem [shape: f32[2,1,32], index: 7, kind: input, shape index: {}]   ;;  %s2247_s8 = inlined_call_operand.vmem [shape: f32[2,32,128], index: 8, kind: input, shape index: {}]   ;;  %s2248_s9 = inlined_call_operand.vmem [shape: f32[2,1,128], index: 9, kind: input, shape index: {}]   ;;  %s2249_s10 = inlined_call_operand.vmem [shape: f32[2,128,32], index: 10, kind: input, shape index: {}]   ;;  %s2250_s11 = inlined_call_operand.vmem [shape: f32[2,1,32], index: 11, kind: input, shape index: {}]   ;;  %s2251_s12 = inlined_call_operand.vmem [shape: f32[2,1,32], index: 12, kind: input, shape index: {}]   ;;  %s2252_s13 = inlined_call_operand.vmem [shape: f32[2,1,32], index: 13, kind: input, shape index: {}]   ;;  %s2253_s14 = inlined_call_operand.hbm [shape: f32[2,8,32], index: 14, kind: output, shape index: {}]  }
   0x1   :  { %2256 = sst [smem:[#allocation6_spill]] %s2239_s0 }
   0x2   :  { %2257 = sst [smem:[#allocation7_spill]] %s2240_s1 }
   0x3   :  { %2258 = sst [smem:[#allocation8_spill]] %s2241_s2 }
   0x4   :  { %2259 = sst [smem:[#allocation9_spill]] %s2243_s4 }
   0x5   :  { %2260 = sst [smem:[#allocation10_spill]] %s2253_s14 }
   0x6   :  { %19 = vsyncpa [#allocation3], 0  ;;  %s1966_s29 = smov 0  }
   0x7 LB: > { %2261 = sst [smem:[#allocation5_spill]] %s1874_s29  ;;  %s1972_s30 = sadd.s32 4294967295, %s1874_s29   ;;  %s1874_s29 = sphi %s1966_s29, %s25_s29  }
   0x8   : > { %p1703_p0 = scmp.ge.s32.totalorder %s1874_s29, 1  ;;  %p502_p1 = scmp.lt.s32.totalorder %s1874_s29, 3 }
   0xa   : > { %p503_p2 = pnand %p1703_p0, %p502_p1 }
   0xb   : > { %p582_p3 = scmp.lt.s32.totalorder (!%p503_p2), %s1972_s30, 1  ;;  %s2262_s2 = sld [smem:[#allocation8_spill]] (!%p503_p2) }
   0xc   : > { %506 = sbr.rel (%p503_p2) target bundleno = 2581 (0xa15), region = 76  ;;  %s2263_s4 = sld [smem:[#allocation9_spill]] (!%p503_p2) }
   0xd   : > { %p1712_p4 = scmp.ne.s32.totalorder (!%p503_p2), %s1972_s30, 0 }
  0x11   : > { %s1978_s15 = scalar_select %p582_p3, %s1972_s30, 1 }
  0x12   : > { %s2264_s26 = sld [smem:[#allocation6_spill]] (!%p1712_p4) }
  0x13   : > { %s1753_s16 = sshll.u32 %s1978_s15, 5  ;;  %s619_s0 = scalar_lea.vmem %s2250_s11, %s1978_s15 }
  0x14   : > { %s586_s22 = scalar_lea.vmem %s2262_s2, %s1753_s16  ;;  %s1991_s25 = scalar_lea.vmem %s2263_s4, %s1753_s16 }
  0x15   : > { %s2008_s21 = scalar_lea.vmem %s2247_s8, %s1753_s16  ;;  %s1756_s4 = sshll.u32 %s1978_s15, 7 }
  0x16   : > { %s2018_s28 = scalar_lea.vmem %s2249_s10, %s1756_s4  ;;  %s622_s19 = scalar_lea.vmem %s2251_s12, %s1978_s15 }
  0x17   : > { %s625_s1 = scalar_lea.vmem %s2252_s13, %s1978_s15  ;;  %629 = sbr.rel (%p1712_p4) target bundleno = 35 (0x23), region = 80 }
  0x18   : > { %s2265_s2 = sld [smem:[#allocation7_spill]] (!%p1712_p4) }
  0x1c   : > { %v630_v0 = vld [vmem:[%s2264_s26] sm:$0xff]  ;;  %vm635_vm0 = vcmask 261120   ;;  %v631_v2 = vld [vmem:[%s2264_s26 + $0x8] sm:$0xff] }
  0x1e   : > { %v632_v1 = vld [vmem:[%s2265_s2] sm:$0xff] }
  0x1f   : > { %v633_v3 = vadd.f32 %v632_v1, %v630_v0  ;;  %v634_v4 = vadd.f32 %v632_v1, %v631_v2 }
  0x21   : > { %636 = vst.msk [vmem:[#allocation2] sm:$0xff] %vm635_vm0, %v633_v3 }
  0x22   : > { %637 = vst.msk [vmem:[#allocation2 + $0x8] sm:$0xff] %vm635_vm0, %v634_v4 }
  0x23 PF: > { %v643_v5 = vld [vmem:[%s586_s22 + $0x18] sm:$0xff]  ;;  %v642_v6 = vld [vmem:[%s586_s22 + $0x10] sm:$0xff]  ;;  %v641_v7 = vld [vmem:[%s586_s22 + $0x8] sm:$0xff]  ;;  %vm648_vm1 = vcmask 261120   ;;  %s2266_s17 = scalar_lea.vmem %s2242_s3, %s1978_s15  ;;  %s1877_s16 = smov 96   ;;  %vm685_vm2 = vcmask 64512  }
  0x24   : > { %667 = vmatpush.msra.mxu0 %v643_v5  ;;  %v640_v8 = vld [vmem:[%s586_s22] sm:$0xff]  ;;  %s1876_s22 = smov 88   ;;  %s1878_s20 = smov 120  }
  0x25   : > { %v1786_v11 = vld [vmem:[%s2266_s17] ss:$0 sm:$0xff]  ;;  %s1879_s23 = smov 64   ;;  %s1880_s24 = smov 80  }
  0x26   : > { %668 = vmatpush.msra.mxu0 %v642_v6  ;;  %s1881_s4 = smov 112   ;;  %s1882_s27 = smov 56  }
  0x27   : > { %s1883_s14 = smov 72   ;;  %s1884_s29 = smov 48  }
  0x28   : > { %669 = vmatpush.msra.mxu0 %v641_v7  ;;  %v2042_v9 = vld [vmem:[#allocation2] sm:$0xff]  ;;  %s1885_s2 = smov 104   ;;  %s1886_s18 = smov 40  }
  0x29   : > { %v2046_v10 = vld [vmem:[#allocation2 + $0x8] sm:$0xff]  ;;  %p1761_p5 = scmp.eq.s32.totalorder %s1972_s30, 1 }
  0x2a   : > { %670 = vmatpush.msra.mxu0 %v640_v8 }
  0x2b   : > { %1713 = vmatmul.msk.f32.vlgmr.msra.gmra.mxu0 %vm648_vm1, %v2042_v9 }
  0x33   : > { %1714 = vmatmul.msk.f32.gmra.mxu0 %vm648_vm1, %v2046_v10 }
  0xa8   : > { %v672_v12 = vpop.f32.mrf.mxu0 }
  0xa9   : > { %v2055_v13 = vadd.f32 %v1786_v11, %v672_v12  ;;  %v679_v12 = vld [vmem:[%s1991_s25 + $0x8] sm:$0xff] }
  0xaa   : > { %966 = vmatpush.msrb.mxu0 %v679_v12 }
  0xab   : > { %815 = vrot.lane.b32.xlu1 %v2055_v13, %s1876_s22  ;;  %683 = vrot.lane.b32.xlu0 %v2055_v13, %s1877_s16 }
  0xb0   : > { %v675_v14 = vpop.f32.mrf.mxu0 }
  0xb1   : > { %v2059_v15 = vadd.f32 %v1786_v11, %v675_v14  ;;  %v678_v14 = vld [vmem:[%s1991_s25] sm:$0xff] }
  0xb2   : > { %995 = vmatpush.msra.mxu0 %v678_v14 }
  0xb3   : > { %843 = vrot.lane.b32.xlu2 %v2059_v15, %s1876_s22  ;;  %813 = vrot.lane.b32.xlu1 %v2055_v13, %s1878_s20 }
  0xb4   : > { %711 = vrot.lane.b32.xlu0 %v2059_v15, %s1877_s16  ;;  %s2267_s16 = scalar_lea.vmem %s2244_s5, %s1978_s15 }
  0xbb   : > { %841 = vrot.lane.b32.xlu2 %v2059_v15, %s1878_s20  ;;  %s2268_s20 = scalar_lea.vmem %s2245_s6, %s1978_s15 }
 0x10d   : > { %v844_v19 = vpop.permute.xlu2 %843 }
 0x115   : > { %v842_v21 = vpop.permute.xlu2 %841 }
 0x11d   : > { %v816_v16 = vpop.permute.xlu1 %815  ;;  %v684_v17 = vpop.permute.xlu0 %683 }
 0x11e   : > { %1715 = vmatpush.xpose.msk.msra.mxu1 %vm685_vm2, %v684_v17 }
 0x121   : > { %1716 = vmatmul.msk.f32.vlgmr.msra.gmra.mxu1 %vm685_vm2, %v2055_v13 }
 0x122   : > { %1721 = vmatpush.xpose.msk.msrb.mxu1 %vm685_vm2, %v816_v16 }
 0x125   : > { %v814_v20 = vpop.permute.xlu1 %813 }
 0x126   : > { %v712_v18 = vpop.permute.xlu0 %711 }
 0x127   : > { %1717 = vmatpush.xpose.msk.msra.mxu2 %vm685_vm2, %v712_v18 }
 0x129   : > { %1722 = vmatmul.msk.f32.vlgmr.msrb.gmra.mxu1 %vm685_vm2, %v814_v20 }
 0x12a   : > { %1718 = vmatmul.msk.f32.vlgmr.msra.gmra.mxu2 %vm685_vm2, %v2059_v15 }
 0x12b   : > { %1723 = vmatpush.xpose.msk.msrb.mxu2 %vm685_vm2, %v844_v19 }
 0x132   : > { %1724 = vmatmul.msk.f32.vlgmr.msrb.gmra.mxu2 %vm685_vm2, %v842_v21 }
 0x19e   : > { %v707_v22 = vpop.f32.mrf.mxu1 }
 0x19f   : > { %v737_v23 = vmul.f32 0.35355338, %v707_v22 }
 0x1a1   : > { %v739_v24 = vsel %vm685_vm2, %v737_v23, -inf }
 0x1a2   : > { %740 = vmax.xlane.f32.xlu0 %v739_v24 }
 0x1a6   : > { %v838_v25 = vpop.f32.mrf.mxu1 }
 0x1a7   : > { %v869_v26 = vmul.f32 0.35355338, %v838_v25 }
 0x1a9   : > { %v871_v27 = vsel %vm685_vm2, %v869_v26, -inf }
 0x1aa   : > { %872 = vmax.xlane.f32.xlu2 %v871_v27 }
 0x1ad   : > { %v734_v28 = vpop.f32.mrf.mxu2 }
 0x1ae   : > { %v738_v29 = vmul.f32 0.35355338, %v734_v28 }
 0x1b0   : > { %v742_v30 = vsel %vm685_vm2, %v738_v29, -inf }
 0x1b1   : > { %743 = vmax.xlane.f32.xlu1 %v742_v30 }
 0x1b5   : > { %v866_v31 = vpop.f32.mrf.mxu2 }
 0x1b6   : > { %787 = vrot.lane.b32.xlu0 %v2059_v15, %s1879_s23  ;;  %v870_v32 = vmul.f32 0.35355338, %v866_v31 }
 0x1b8   : > { %v874_v33 = vsel %vm685_vm2, %v870_v32, -inf }
 0x1ca   : > { %761 = vrot.lane.b32.xlu1 %v2055_v13, %s1879_s23  ;;  %s1890_s23 = smov 8  }
 0x1d2   : > { %1005 = vrot.lane.b32.xlu1 %v2055_v13, %s1880_s24 }
 0x1fc   : > { %875 = vmax.xlane.f32.xlu1 %v874_v33 }
 0x215   : > { %1031 = vrot.lane.b32.xlu1 %v2059_v15, %s1881_s4  ;;  %v741_v34 = vpop.xlane.xlu0 %740 }
 0x216   : > { %v745_v35 = vsub.f32 %v737_v23, %v741_v34 }
 0x218   : > { %v747_v36 = vmul.f32 1.442695, %v745_v35 }
 0x21a   : > { %1794 = vpow2.f32 %v747_v36 }
 0x21d   : > { %v873_v37 = vpop.xlane.xlu2 %872 }
 0x21e   : > { %v877_v38 = vsub.f32 %v869_v26, %v873_v37 }
 0x220   : > { %v1795_v39 = vpop.eup %1794  ;;  %v879_v40 = vmul.f32 1.442695, %v877_v38 }
 0x221   : > { %v751_v41 = vsel %vm685_vm2, %v1795_v39, 0.0 }
 0x222   : > { %1796 = vpow2.f32 %v879_v40  ;;  %752 = vadd.xlane.f32.xlu2 %v751_v41 }
 0x224   : > { %v744_v42 = vpop.xlane.xlu1 %743 }
 0x225   : > { %v746_v43 = vsub.f32 %v738_v29, %v744_v42 }
 0x227   : > { %v749_v44 = vmul.f32 1.442695, %v746_v43 }
 0x228   : > { %v1797_v45 = vpop.eup %1796  ;;  %v788_v50 = vpop.permute.xlu0 %787 }
 0x229   : > { %1798 = vpow2.f32 %v749_v44  ;;  %v883_v46 = vsel %vm685_vm2, %v1797_v45, 0.0 }
 0x22a   : > { %884 = vadd.xlane.f32.xlu2 %v883_v46 }
 0x22f   : > { %v1799_v47 = vpop.eup %1798 }
 0x230   : > { %v754_v48 = vsel %vm685_vm2, %v1799_v47, 0.0 }
 0x231   : > { %755 = vadd.xlane.f32.xlu0 %v754_v48  ;;  %v680_v48 = vld [vmem:[%s1991_s25 + $0x10] sm:$0xff] }
 0x232   : > { %1156 = vmatpush.msra.mxu2 %v680_v48 }
 0x23c   : > { %v762_v49 = vpop.permute.xlu1 %761 }
 0x23d   : > { %782 = vmatpush.msra.mxu3 %v762_v49 }
 0x23f   : > { %808 = vmatpush.msrb.mxu3 %v788_v50 }
 0x242   : > { %893 = vrot.lane.b32.xlu2 %v2055_v13, %s1882_s27 }
 0x244   : > { %v1006_v51 = vpop.permute.xlu1 %1005 }
 0x245   : > { %1003 = vrot.lane.b32.xlu0 %v2055_v13, %s1881_s4  ;;  %s2269_s4 = scalar_lea.vmem %s2246_s7, %s1978_s15 }
 0x24a   : > { %919 = vrot.lane.b32.xlu2 %v2059_v15, %s1882_s27 }
 0x26f   : > { %v876_v52 = vpop.xlane.xlu1 %875 }
 0x270   : > { %v878_v53 = vsub.f32 %v870_v32, %v876_v52 }
 0x272   : > { %v881_v54 = vmul.f32 1.442695, %v878_v53 }
 0x274   : > { %1800 = vpow2.f32 %v881_v54 }
 0x27a   : > { %v1801_v55 = vpop.eup %1800 }
 0x27b   : > { %v886_v56 = vsel %vm685_vm2, %v1801_v55, 0.0 }
 0x27c   : > { %887 = vadd.xlane.f32.xlu0 %v886_v56 }
 0x287   : > { %v1032_v11 = vpop.permute.xlu1 %1031 }
 0x290   : > { %1033 = vrot.lane.b32.xlu0 %v2059_v15, %s1880_s24 }
 0x295   : > { %v753_v57 = vpop.xlane.xlu2 %752 }
 0x296   : > { %1802 = vrcp.f32 %v753_v57 }
 0x298   : > { %1168 = vrot.lane.b32.xlu0 %v2055_v13, %s1883_s14 }
 0x29c   : > { %v1803_v58 = vpop.eup %1802 }
 0x29d   : > { %v885_v59 = vpop.xlane.xlu2 %884  ;;  %v759_v60 = vmul.f32 %v1803_v58, %v1795_v39 }
 0x29f   : > { %1719 = vmatmul.msk.f32.vlgmr.msra.gmra.mxu3 %vm685_vm2, %v759_v60 }
 0x2a0   : > { %1196 = vrot.lane.b32.xlu0 %v2059_v15, %s1883_s14 }
 0x2a4   : > { %v756_v61 = vpop.xlane.xlu0 %755 }
 0x2a5   : > { %1804 = vrcp.f32 %v756_v61  ;;  %v894_v62 = vpop.permute.xlu2 %893 }
 0x2a6   : > { %914 = vmatpush.msra.mxu3 %v894_v62  ;;  %1806 = vrcp.f32 %v885_v59 }
 0x2ab   : > { %v1805_v63 = vpop.eup %1804 }
 0x2ac   : > { %v760_v0 = vmul.f32 %v1805_v63, %v1799_v47  ;;  %v1807_v2 = vpop.eup %1806 }
 0x2ad   : > { %v920_v1 = vpop.permute.xlu2 %919  ;;  %v891_v3 = vmul.f32 %v1807_v2, %v1797_v45 }
 0x2ae   : > { %1720 = vmatmul.msk.f32.vlgmr.msrb.gmra.mxu3 %vm685_vm2, %v760_v0  ;;  %940 = vmatpush.msra.mxu1 %v920_v1 }
 0x2af   : > { %1731 = vmatpush.xpose.msk.msrb.mxu3 %vm685_vm2, %v1006_v51 }
 0x2b6   : > { %1725 = vmatmul.msk.f32.vlgmr.msra.gmra.mxu3 %vm685_vm2, %v891_v3 }
 0x2b7   : > { %v1004_v4 = vpop.permute.xlu0 %1003 }
 0x2be   : > { %1732 = vmatmul.msk.f32.vlgmr.msrb.gmra.mxu3 %vm685_vm2, %v1004_v4 }
 0x2ef   : > { %v888_v5 = vpop.xlane.xlu0 %887 }
 0x2f0   : > { %1808 = vrcp.f32 %v888_v5 }
 0x2f6   : > { %v1809_v6 = vpop.eup %1808 }
 0x2f7   : > { %v892_v7 = vmul.f32 %v1809_v6, %v1801_v55 }
 0x2f9   : > { %1726 = vmatmul.msk.f32.vlgmr.msra.gmra.mxu1 %vm685_vm2, %v892_v7 }
 0x302   : > { %v1034_v8 = vpop.permute.xlu0 %1033 }
 0x303   : > { %1733 = vmatpush.xpose.msk.msrb.mxu1 %vm685_vm2, %v1034_v8 }
 0x306   : > { %1734 = vmatmul.msk.f32.vlgmr.msrb.gmra.mxu1 %vm685_vm2, %v1032_v11 }
 0x30a   : > { %v1169_v19 = vpop.permute.xlu0 %1168 }
 0x312   : > { %v1197_v31 = vpop.permute.xlu0 %1196 }
 0x322   : > { %v784_v16 = vpop.f32.mrf.mxu3 }
 0x331   : > { %v810_v17 = vpop.f32.mrf.mxu3 }
 0x339   : > { %v916_v18 = vpop.f32.mrf.mxu3 }
 0x33a   : > { %1727 = vmatmul.msk.f32.vlgmr.msrb.gmra.mxu0 %vm685_vm2, %v916_v18 }
 0x33b   : > { %1739 = vmatpush.xpose.msk.msrb.mxu0 %vm685_vm2, %v1169_v19 }
 0x341   : > { %v1028_v20 = vpop.f32.mrf.mxu3 }
 0x342   : > { %v1059_v21 = vmul.f32 0.35355338, %v1028_v20 }
 0x344   : > { %v1061_v22 = vsel %vm685_vm2, %v1059_v21, -inf }
 0x345   : > { %1062 = vmax.xlane.f32.xlu2 %v1061_v22 }
 0x35d   : > { %1083 = vrot.lane.b32.xlu2 %v2055_v13, %s1884_s29 }
 0x365   : > { %1194 = vrot.lane.b32.xlu2 %v2059_v15, %s1885_s2 }
 0x376   : > { %v942_v23 = vpop.f32.mrf.mxu1 }
 0x377   : > { %1728 = vmatmul.msk.f32.gmra.mxu0 %vm685_vm2, %v942_v23  ;;  %v1787_v23 = vld [vmem:[%s2267_s16] ss:$0 sm:$0xff] }
 0x37f   : > { %1729 = vmatmul.msk.f32.vlgmr.msra.gmra.mxu0 %vm685_vm2, %v784_v16 }
 0x383   : > { %v1056_v24 = vpop.f32.mrf.mxu1 }
 0x384   : > { %v1060_v25 = vmul.f32 0.35355338, %v1056_v24 }
 0x386   : > { %v1064_v26 = vsel %vm685_vm2, %v1060_v25, -inf }
 0x387   : > { %1730 = vmatmul.msk.f32.gmra.mxu0 %vm685_vm2, %v810_v17  ;;  %1065 = vmax.xlane.f32.xlu0 %v1064_v26 }
 0x3b7   : > { %v968_v34 = vpop.f32.mrf.mxu0 }
 0x3b8   : > { %v1063_v27 = vpop.xlane.xlu2 %1062 }
 0x3b9   : > { %v1067_v28 = vsub.f32 %v1059_v21, %v1063_v27 }
 0x3bb   : > { %v1069_v29 = vmul.f32 1.442695, %v1067_v28 }
 0x3bd   : > { %1810 = vpow2.f32 %v1069_v29 }
 0x3c0   : > { %v1084_v30 = vpop.permute.xlu2 %1083 }
 0x3c1   : > { %1104 = vmatpush.msra.mxu3 %v1084_v30 }
 0x3c3   : > { %1741 = vmatpush.xpose.msk.msrb.mxu3 %vm685_vm2, %v1197_v31  ;;  %v1811_v32 = vpop.eup %1810 }
 0x3c4   : > { %v1073_v33 = vsel %vm685_vm2, %v1811_v32, 0.0 }
 0x3c5   : > { %1074 = vadd.xlane.f32.xlu1 %v1073_v33 }
 0x3c8   : > { %v1195_v46 = vpop.permute.xlu2 %1194 }
 0x3de   : > { %1166 = vrot.lane.b32.xlu1 %v2055_v13, %s1885_s2 }
 0x3f4   : > { %v2118_v35 = vpop.f32.mrf.mxu0 }
 0x3fa   : > { %v1066_v36 = vpop.xlane.xlu0 %1065 }
 0x3fb   : > { %v1068_v37 = vsub.f32 %v1060_v25, %v1066_v36 }
 0x3fc   : > { %v997_v38 = vpop.f32.mrf.mxu0 }
 0x3fd   : > { %v1071_v39 = vmul.f32 1.442695, %v1068_v37  ;;  %v2120_v40 = vadd.f32 %v997_v38, %v968_v34  ;;  %v1887_v38 = vmov 32.0  }
 0x3ff   : > { %1812 = vpow2.f32 %v1071_v39 }
 0x404   : > { %v2127_v50 = vpop.f32.mrf.mxu0 }
 0x405   : > { %v1813_v41 = vpop.eup %1812  ;;  %v1001_v28 = vadd.f32 %v2127_v50, %v2118_v35 }
 0x406   : > { %v1076_v42 = vsel %vm685_vm2, %v1813_v41, 0.0 }
 0x407   : > { %1077 = vadd.xlane.f32.xlu0 %v1076_v42 }
 0x438   : > { %v1075_v43 = vpop.xlane.xlu1 %1074 }
 0x439   : > { %1814 = vrcp.f32 %v1075_v43 }
 0x43f   : > { %v1815_v44 = vpop.eup %1814 }
 0x440   : > { %v1081_v45 = vmul.f32 %v1815_v44, %v1811_v32 }
 0x442   : > { %1735 = vmatmul.msk.f32.vlgmr.msra.gmra.mxu3 %vm685_vm2, %v1081_v45 }
 0x44a   : > { %1742 = vmatmul.msk.f32.vlgmr.msrb.gmra.mxu3 %vm685_vm2, %v1195_v46 }
 0x450   : > { %v1167_v47 = vpop.permute.xlu1 %1166 }
 0x451   : > { %1740 = vmatmul.msk.f32.vlgmr.msrb.gmra.mxu0 %vm685_vm2, %v1167_v47 }
 0x47a   : > { %v1078_v57 = vpop.xlane.xlu0 %1077 }
 0x47b   : > { %1816 = vrcp.f32 %v1078_v57 }
 0x481   : > { %v1817_v0 = vpop.eup %1816 }
 0x482   : > { %v1082_v1 = vmul.f32 %v1817_v0, %v1813_v41  ;;  %v1451_v0 = vld [vmem:[%s2018_s28 + $0x60] sm:$0xff] }
 0x4c5   : > { %v1106_v49 = vpop.f32.mrf.mxu3 }
 0x4c6   : > { %1737 = vmatmul.msk.f32.vlgmr.msra.gmra.mxu2 %vm685_vm2, %v1106_v49 }
 0x4cd   : > { %v1219_v51 = vpop.f32.mrf.mxu3 }
 0x4ce   : > { %v1223_v52 = vmul.f32 0.35355338, %v1219_v51  ;;  %v1191_v53 = vpop.f32.mrf.mxu0 }
 0x4cf   : > { %v1222_v54 = vmul.f32 0.35355338, %v1191_v53  ;;  %v1402_v53 = vld [vmem:[%s2008_s21 + $0x10] sm:$0xff] }
 0x4d0   : > { %v1227_v55 = vsel %vm685_vm2, %v1223_v52, -inf }
 0x4d1   : > { %1228 = vmax.xlane.f32.xlu2 %v1227_v55  ;;  %v1224_v56 = vsel %vm685_vm2, %v1222_v54, -inf  ;;  %v1400_v55 = vld [vmem:[%s2008_s21] sm:$0xff] }
 0x4d2   : > { %1225 = vmax.xlane.f32.xlu1 %v1224_v56 }
 0x4e9   : > { %1109 = vrot.lane.b32.xlu2 %v2059_v15, %s1884_s29  ;;  %s2270_s29 = scalar_lea.vmem %s2248_s9, %s1978_s15  ;;  %s2271_s15 = sld [smem:[#allocation10_spill]] }
 0x544   : > { %v1229_v58 = vpop.xlane.xlu2 %1228 }
 0x545   : > { %v1231_v59 = vsub.f32 %v1223_v52, %v1229_v58  ;;  %v1226_v60 = vpop.xlane.xlu1 %1225  ;;  %v1403_v52 = vld [vmem:[%s2008_s21 + $0x18] sm:$0xff] }
 0x546   : > { %v1230_v61 = vsub.f32 %v1222_v54, %v1226_v60  ;;  %v1401_v54 = vld [vmem:[%s2008_s21 + $0x8] sm:$0xff]  ;;  %v1453_v60 = vld [vmem:[%s2018_s28 + $0x70] sm:$0xff] }
 0x547   : > { %v1234_v62 = vmul.f32 1.442695, %v1231_v59  ;;  %v1454_v59 = vld [vmem:[%s2018_s28 + $0x78] sm:$0xff] }
 0x548   : > { %v1232_v63 = vmul.f32 1.442695, %v1230_v61  ;;  %1459 = vmatpush.msrb.mxu2 %v1454_v59  ;;  %v1452_v61 = vld [vmem:[%s2018_s28 + $0x68] sm:$0xff] }
 0x549   : > { %1818 = vpow2.f32 %v1234_v62  ;;  %v1158_v21 = vpop.f32.mrf.mxu2 }
 0x54a   : > { %1820 = vpow2.f32 %v1232_v63  ;;  %v1164_v22 = vadd.f32 %v1158_v21, %v2120_v40  ;;  %1460 = vmatpush.msrb.mxu2 %v1453_v60 }
 0x54c   : > { %v1110_v2 = vpop.permute.xlu2 %1109  ;;  %1461 = vmatpush.msrb.mxu2 %v1452_v61 }
 0x54d   : > { %1130 = vmatpush.msra.mxu1 %v1110_v2 }
 0x54e   : > { %1736 = vmatmul.msk.f32.vlgmr.msra.gmra.mxu1 %vm685_vm2, %v1082_v1  ;;  %1462 = vmatpush.msrb.mxu2 %v1451_v0 }
 0x54f   : > { %v1819_v3 = vpop.eup %1818 }
 0x550   : > { %v1821_v4 = vpop.eup %1820  ;;  %v1239_v5 = vsel %vm685_vm2, %v1819_v3, 0.0 }
 0x551   : > { %1240 = vadd.xlane.f32.xlu0 %v1239_v5  ;;  %v1236_v6 = vsel %vm685_vm2, %v1821_v4, 0.0  ;;  %v1449_v5 = vld [vmem:[%s2018_s28 + $0x50] sm:$0xff] }
 0x552   : > { %1237 = vadd.xlane.f32.xlu1 %v1236_v6 }
 0x565   : > { %1272 = vrot.lane.b32.xlu0 %v2059_v15, %s1886_s18 }
 0x56b   : > { %1246 = vrot.lane.b32.xlu1 %v2055_v13, %s1886_s18  ;;  %v681_v13 = vld [vmem:[%s1991_s25 + $0x18] sm:$0xff] }
 0x56c   : > { %1319 = vmatpush.msra.mxu3 %v681_v13  ;;  %v1445_v13 = vld [vmem:[%s2018_s28 + $0x30] sm:$0xff] }
 0x5c4   : > { %v1241_v7 = vpop.xlane.xlu0 %1240 }
 0x5c5   : > { %1822 = vrcp.f32 %v1241_v7  ;;  %v1238_v11 = vpop.xlane.xlu1 %1237  ;;  %v1448_v7 = vld [vmem:[%s2018_s28 + $0x48] sm:$0xff] }
 0x5c6   : > { %1824 = vrcp.f32 %v1238_v11  ;;  %v1447_v11 = vld [vmem:[%s2018_s28 + $0x40] sm:$0xff] }
 0x5c7   : > { %1826 = vrcp.f32 %v1887_v38  ;;  %v1439_v38 = vld [vmem:[%s2018_s28] sm:$0xff] }
 0x5cb   : > { %v1132_v8 = vpop.f32.mrf.mxu1  ;;  %v1823_v12 = vpop.eup %1822 }
 0x5cc   : > { %1738 = vmatmul.msk.f32.gmra.mxu2 %vm685_vm2, %v1132_v8  ;;  %v1245_v14 = vmul.f32 %v1823_v12, %v1819_v3  ;;  %v1825_v17 = vpop.eup %1824  ;;  %v1450_v3 = vld [vmem:[%s2018_s28 + $0x58] sm:$0xff] }
 0x5cd   : > { %v1244_v18 = vmul.f32 %v1825_v17, %v1821_v4  ;;  %v1827_v39 = vpop.eup %1826  ;;  %1463 = vmatpush.msrb.mxu2 %v1450_v3 }
 0x5ce   : > { %v1344_v40 = vmul.f32 32.0, %v1827_v39  ;;  %vm1348_vm3 = vweird.f32 %v1827_v39 }
 0x5cf   : > { %1464 = vmatpush.msrb.mxu2 %v1449_v5 }
 0x5d0   : > { %v1345_v41 = vsub.f32 1.0, %v1344_v40 }
 0x5d1   : > { %1465 = vmatpush.msrb.mxu2 %v1448_v7 }
 0x5d2   : > { %v1346_v35 = vmul.f32 %v1827_v39, %v1345_v41 }
 0x5d3   : > { %1466 = vmatpush.msrb.mxu2 %v1447_v11 }
 0x5d7   : > { %v1273_v16 = vpop.permute.xlu0 %1272 }
 0x5d8   : > { %1293 = vmatpush.msra.mxu0 %v1273_v16  ;;  %v1446_v16 = vld [vmem:[%s2018_s28 + $0x38] sm:$0xff] }
 0x5d9   : > { %1744 = vmatmul.msk.f32.vlgmr.msra.gmra.mxu0 %vm685_vm2, %v1245_v14  ;;  %1467 = vmatpush.msrb.mxu2 %v1446_v16 }
 0x5db   : > { %1468 = vmatpush.msrb.mxu2 %v1445_v13 }
 0x5dd   : > { %v1247_v15 = vpop.permute.xlu1 %1246 }
 0x5de   : > { %1267 = vmatpush.msrb.mxu1 %v1247_v15  ;;  %v1788_v15 = vld [vmem:[%s2268_s20] ss:$0 sm:$0xff]  ;;  %s1889_s20 = smov 128  }
 0x5df   : > { %1743 = vmatmul.msk.f32.vlgmr.msrb.gmra.mxu1 %vm685_vm2, %v1244_v18 }
 0x5e0   : > { %1426 = vmatpush.msra.mxu1 %v1403_v52 }
 0x5e2   : > { %1427 = vmatpush.msra.mxu1 %v1402_v53 }
 0x5e4   : > { %1428 = vmatpush.msra.mxu1 %v1401_v54 }
 0x5e6   : > { %1429 = vmatpush.msra.mxu1 %v1400_v55 }
 0x64f   : > { %v1161_v27 = vpop.f32.mrf.mxu2 }
 0x650   : > { %v1165_v30 = vadd.f32 %v1161_v27, %v1001_v28 }
 0x656   : > { %v1295_v20 = vpop.f32.mrf.mxu0 }
 0x65c   : > { %v1269_v19 = vpop.f32.mrf.mxu1 }
 0x65d   : > { %1745 = vmatmul.msk.f32.vlgmr.msra.gmra.mxu3 %vm685_vm2, %v1269_v19 }
 0x665   : > { %1746 = vmatmul.msk.f32.gmra.mxu3 %vm685_vm2, %v1295_v20 }
 0x6e0   : > { %v1321_v24 = vpop.f32.mrf.mxu3 }
 0x6e1   : > { %v1327_v25 = vadd.f32 %v1321_v24, %v1164_v22  ;;  %v1789_v22 = vld [vmem:[%s2269_s4] ss:$0 sm:$0xff] }
 0x6e3   : > { %v1333_v26 = vadd.f32 %v1787_v23, %v1327_v25 }
 0x6e5   : > { %v1335_v29 = vadd.f32 %v1333_v26, %v2042_v9  ;;  %v1347_v9 = vadd.f32 %v1827_v39, %v1346_v35  ;;  %v1443_v26 = vld [vmem:[%s2018_s28 + $0x20] sm:$0xff] }
 0x6e7   : > { %v1337_v31 = vsel %vm648_vm1, %v1335_v29, 0.0  ;;  %v2157_v42 = vsel %vm1348_vm3, %v1827_v39, %v1347_v9  ;;  %v1790_v39 = vld [vmem:[%s2270_s29] ss:$0 sm:$0xff] }
 0x6e8   : > { %1338 = vadd.xlane.f32.xlu2 %v1337_v31  ;;  %v1324_v32 = vpop.f32.mrf.mxu3 }
 0x6e9   : > { %v1328_v33 = vadd.f32 %v1324_v32, %v1165_v30 }
 0x6eb   : > { %v1334_v34 = vadd.f32 %v1787_v23, %v1328_v33  ;;  %v1444_v23 = vld [vmem:[%s2018_s28 + $0x28] sm:$0xff] }
 0x6ec   : > { %1469 = vmatpush.msrb.mxu2 %v1444_v23 }
 0x6ed   : > { %v1336_v36 = vadd.f32 %v1334_v34, %v2046_v10 }
 0x6ee   : > { %1470 = vmatpush.msrb.mxu2 %v1443_v26 }
 0x6ef   : > { %v1340_v37 = vsel %vm648_vm1, %v1336_v36, 0.0 }
 0x6f0   : > { %1341 = vadd.xlane.f32.xlu1 %v1340_v37  ;;  %v1440_v37 = vld [vmem:[%s2018_s28 + $0x8] sm:$0xff] }
 0x75b   : > { %v1339_v43 = vpop.xlane.xlu2 %1338 }
 0x75c   : > { %v1350_v44 = vmul.f32 %v2157_v42, %v1339_v43 }
 0x75e   : > { %v1352_v10 = vsub.f32 %v1335_v29, %v1350_v44  ;;  %v1442_v29 = vld [vmem:[%s2018_s28 + $0x18] sm:$0xff] }
 0x75f   : > { %1471 = vmatpush.msrb.mxu2 %v1442_v29 }
 0x760   : > { %v1354_v45 = vmul.f32 %v1352_v10, %v1352_v10 }
 0x762   : > { %v1356_v46 = vsel %vm648_vm1, %v1354_v45, 0.0 }
 0x763   : > { %1357 = vadd.xlane.f32.xlu0 %v1356_v46  ;;  %v1342_v47 = vpop.xlane.xlu1 %1341 }
 0x764   : > { %v1351_v48 = vmul.f32 %v2157_v42, %v1342_v47 }
 0x766   : > { %v2162_v49 = vsub.f32 %v1336_v36, %v1351_v48  ;;  %v1441_v36 = vld [vmem:[%s2018_s28 + $0x10] sm:$0xff] }
 0x767   : > { %1472 = vmatpush.msrb.mxu2 %v1441_v36 }
 0x768   : > { %v1355_v50 = vmul.f32 %v2162_v49, %v2162_v49 }
 0x769   : > { %1473 = vmatpush.msrb.mxu2 %v1440_v37 }
 0x76a   : > { %v1359_v51 = vsel %vm648_vm1, %v1355_v50, 0.0 }
 0x76b   : > { %1360 = vadd.xlane.f32.xlu2 %v1359_v51  ;;  %1474 = vmatpush.msrb.mxu2 %v1439_v38 }
 0x7d6   : > { %v1358_v56 = vpop.xlane.xlu0 %1357 }
 0x7d7   : > { %v1362_v57 = vmul.f32 %v1358_v56, %v2157_v42 }
 0x7d9   : > { %v1364_v58 = vadd.f32 1e-05, %v1362_v57 }
 0x7db   : > { %1828 = vrsqrt.f32 %v1364_v58  ;;  %vm1372_vm5 = vweird.f32 %v1364_v58 }
 0x7de   : > { %v1361_v62 = vpop.xlane.xlu2 %1360 }
 0x7df   : > { %v1363_v63 = vmul.f32 %v1361_v62, %v2157_v42 }
 0x7e1   : > { %v1829_v1 = vpop.eup %1828  ;;  %v1365_v2 = vadd.f32 1e-05, %v1363_v63 }
 0x7e2   : > { %v1367_v4 = vmul.f32 %v1829_v1, %v1364_v58  ;;  %vm1373_vm4 = vweird.f32 %v1829_v1 }
 0x7e3   : > { %1830 = vrsqrt.f32 %v1365_v2  ;;  %vm1374_vm6 = vmor %vm1372_vm5, %vm1373_vm4  ;;  %vm1382_vm8 = vweird.f32 %v1365_v2 }
 0x7e4   : > { %v1368_v6 = vmul.f32 %v1829_v1, %v1367_v4 }
 0x7e6   : > { %v1369_v8 = vmul.f32 0.5, %v1368_v6 }
 0x7e8   : > { %v1370_v12 = vsub.f32 1.5, %v1369_v8 }
 0x7e9   : > { %v1831_v14 = vpop.eup %1830 }
 0x7ea   : > { %v1371_v17 = vmul.f32 %v1829_v1, %v1370_v12  ;;  %v1377_v18 = vmul.f32 %v1831_v14, %v1365_v2  ;;  %vm1383_vm7 = vweird.f32 %v1831_v14 }
 0x7eb   : > { %vm1384_vm9 = vmor %vm1382_vm8, %vm1383_vm7 }
 0x7ec   : > { %v1375_v19 = vsel %vm1374_vm6, %v1829_v1, %v1371_v17  ;;  %v1378_v20 = vmul.f32 %v1831_v14, %v1377_v18  ;;  %v1792_v17 = vld [vmem:[%s622_s19] ss:$0 sm:$0xff]  ;;  %s1888_s19 = smov [#allocation2]  }
 0x7ed   : > { %v1386_v21 = vmul.f32 %v1375_v19, %v1352_v10  ;;  %v1791_v10 = vld [vmem:[%s619_s0] ss:$0 sm:$0xff]  ;;  %s1547_s16 = sshll.u32 %s1888_s19, 4  ;;  %s1548_s16 = int_to_ptr.vmem [resolvable:$true] %s1547_s16 }
 0x7ee   : > { %v1379_v24 = vmul.f32 0.5, %v1378_v20 }
 0x7ef   : > { %v1392_v25 = vmul.f32 %v1788_v15, %v1386_v21 }
 0x7f0   : > { %v1380_v27 = vsub.f32 1.5, %v1379_v24 }
 0x7f1   : > { %v1398_v28 = vadd.f32 %v1789_v22, %v1392_v25 }
 0x7f2   : > { %v1381_v30 = vmul.f32 %v1831_v14, %v1380_v27 }
 0x7f3   : > { %1747 = vmatmul.msk.f32.vlgmr.msra.gmra.mxu1 %vm648_vm1, %v1398_v28 }
 0x7f4   : > { %v1385_v31 = vsel %vm1384_vm9, %v1831_v14, %v1381_v30 }
 0x7f5   : > { %v1387_v32 = vmul.f32 %v1385_v31, %v2162_v49 }
 0x7f7   : > { %v1393_v33 = vmul.f32 %v1788_v15, %v1387_v32  ;;  %v1793_v15 = vld [vmem:[%s625_s1] ss:$0 sm:$0xff]  ;;  %s1549_s1 = sshll.u32 %s2271_s15, 4  ;;  %s1550_s1 = int_to_ptr.hbm [resolvable:$true] %s1549_s1 }
 0x7f9   : > { %v1399_v34 = vadd.f32 %v1789_v22, %v1393_v33 }
 0x7fb   : > { %1748 = vmatmul.msk.f32.gmra.mxu1 %vm648_vm1, %v1399_v34 }
 0x870   : > { %v1431_v40 = vpop.f32.mrf.mxu1 }
 0x871   : > { %v1432_v41 = vadd.f32 %v1790_v39, %v1431_v40 }
 0x873   : > { %v1437_v35 = vmax.f32 %v1432_v41, 0.0 }
 0x875   : > { %1475 = vmatmul.f32.vlgmr.msrb.gmra.mxu2 %v1437_v35 }
 0x878   : > { %v1434_v9 = vpop.f32.mrf.mxu1 }
 0x879   : > { %v1435_v43 = vadd.f32 %v1790_v39, %v1434_v9 }
 0x87b   : > { %v1438_v44 = vmax.f32 %v1435_v43, 0.0 }
 0x87d   : > { %1478 = vmatmul.f32.gmra.mxu2 %v1438_v44 }
 0x8f8   : > { %v1476_v45 = vpop.f32.mrf.mxu2 }
 0x8f9   : > { %v1477_v46 = vadd.f32 %v1791_v10, %v1476_v45 }
 0x8fb   : > { %v1482_v47 = vadd.f32 %v1477_v46, %v1398_v28 }
 0x8fd   : > { %v1484_v48 = vsel %vm648_vm1, %v1482_v47, 0.0 }
 0x8fe   : > { %1485 = vadd.xlane.f32.xlu1 %v1484_v48 }
 0x900   : > { %v1479_v49 = vpop.f32.mrf.mxu2 }
 0x901   : > { %v1480_v50 = vadd.f32 %v1791_v10, %v1479_v49 }
 0x903   : > { %v1483_v51 = vadd.f32 %v1480_v50, %v1399_v34 }
 0x905   : > { %v1487_v52 = vsel %vm648_vm1, %v1483_v51, 0.0 }
 0x906   : > { %1488 = vadd.xlane.f32.xlu0 %v1487_v52 }
 0x971   : > { %v1486_v53 = vpop.xlane.xlu1 %1485 }
 0x972   : > { %v1490_v54 = vmul.f32 %v1486_v53, %v2157_v42 }
 0x974   : > { %v1492_v55 = vsub.f32 %v1482_v47, %v1490_v54 }
 0x976   : > { %v1494_v56 = vmul.f32 %v1492_v55, %v1492_v55 }
 0x978   : > { %v1496_v57 = vsel %vm648_vm1, %v1494_v56, 0.0 }
 0x979   : > { %v1489_v58 = vpop.xlane.xlu0 %1488  ;;  %1497 = vadd.xlane.f32.xlu2 %v1496_v57 }
 0x97a   : > { %v1491_v59 = vmul.f32 %v1489_v58, %v2157_v42 }
 0x97c   : > { %v1493_v60 = vsub.f32 %v1483_v51, %v1491_v59 }
 0x97e   : > { %v1495_v61 = vmul.f32 %v1493_v60, %v1493_v60 }
 0x980   : > { %v1499_v62 = vsel %vm648_vm1, %v1495_v61, 0.0 }
 0x981   : > { %1500 = vadd.xlane.f32.xlu1 %v1499_v62 }
 0x9ec   : > { %v1498_v63 = vpop.xlane.xlu2 %1497 }
 0x9ed   : > { %v1502_v0 = vmul.f32 %v1498_v63, %v2157_v42 }
 0x9ef   : > { %v1504_v1 = vadd.f32 1e-05, %v1502_v0 }
 0x9f1   : > { %1832 = vrsqrt.f32 %v1504_v1  ;;  %vm1512_vm11 = vweird.f32 %v1504_v1 }
 0x9f4   : > { %v1501_v2 = vpop.xlane.xlu1 %1500 }
 0x9f5   : > { %v1503_v3 = vmul.f32 %v1501_v2, %v2157_v42 }
 0x9f7   : > { %v1833_v4 = vpop.eup %1832  ;;  %v1505_v5 = vadd.f32 1e-05, %v1503_v3 }
 0x9f8   : > { %v1507_v6 = vmul.f32 %v1833_v4, %v1504_v1  ;;  %vm1513_vm10 = vweird.f32 %v1833_v4 }
 0x9f9   : > { %1834 = vrsqrt.f32 %v1505_v5  ;;  %vm1514_vm12 = vmor %vm1512_vm11, %vm1513_vm10  ;;  %vm1522_vm14 = vweird.f32 %v1505_v5 }
 0x9fa   : > { %v1508_v7 = vmul.f32 %v1833_v4, %v1507_v6 }
 0x9fc   : > { %v1509_v8 = vmul.f32 0.5, %v1508_v7 }
 0x9fe   : > { %v1510_v11 = vsub.f32 1.5, %v1509_v8 }
 0x9ff   : > { %v1835_v12 = vpop.eup %1834 }
 0xa00   : > { %v1511_v14 = vmul.f32 %v1833_v4, %v1510_v11  ;;  %v1517_v16 = vmul.f32 %v1835_v12, %v1505_v5  ;;  %vm1523_vm13 = vweird.f32 %v1835_v12 }
 0xa01   : > { %vm1524_vm15 = vmor %vm1522_vm14, %vm1523_vm13 }
 0xa02   : > { %v1515_v42 = vsel %vm1514_vm12, %v1833_v4, %v1511_v14  ;;  %v1518_v18 = vmul.f32 %v1835_v12, %v1517_v16 }
 0xa03   : > { %v1526_v13 = vmul.f32 %v1515_v42, %v1492_v55 }
 0xa04   : > { %v1519_v19 = vmul.f32 0.5, %v1518_v18 }
 0xa05   : > { %v1532_v20 = vmul.f32 %v1792_v17, %v1526_v13 }
 0xa06   : > { %v1520_v21 = vsub.f32 1.5, %v1519_v19 }
 0xa07   : > { %v1538_v22 = vadd.f32 %v1793_v15, %v1532_v20 }
 0xa08   : > { %v1521_v23 = vmul.f32 %v1835_v12, %v1520_v21 }
 0xa09   : > { %1540 = vst.msk [vmem:[#allocation2] sm:$0xff] %vm648_vm1, %v1538_v22 }
 0xa0a   : > { %v1525_v24 = vsel %vm1524_vm15, %v1835_v12, %v1521_v23 }
 0xa0b   : > { %v1527_v25 = vmul.f32 %v1525_v24, %v1493_v60 }
 0xa0d   : > { %v1533_v26 = vmul.f32 %v1792_v17, %v1527_v25 }
 0xa0f   : > { %v1539_v27 = vadd.f32 %v1793_v15, %v1533_v26 }
 0xa11   : > { %1541 = vst.msk [vmem:[#allocation2 + $0x8] sm:$0xff] %vm648_vm1, %v1539_v27 }
 0xa12   : > { %1758 = dma.vmem_to_hbm [thread:$0]  (%p1761_p5), %s1548_s16, 256, %s1550_s1, [#allocation3], %s1889_s20, %s1889_s20, %s1890_s23  }
 0xa13   : > { %1869 = dma.done.wait (%p1761_p5), [#allocation3], 256  }
 0xa14   : > { %1871 = vsyncadd (%p1761_p5), [#allocation3], 4294967040 }
 0xa15 PF: > { %s2272_s24 = sld [smem:[#allocation5_spill]] }
 0xa1b   : > { %s25_s29 = sadd.s32 1, %s2272_s24  }
 0xa1c   : > { %p22_p6 = scmp.ge.s32.totalorder %s25_s29, 4  }
 0xa1e   :  { %24 = sbr.rel (!%p22_p6) target bundleno = 7 (0x7), region = 140 }
 0xa23   :  { %1566 = vsyncpa [#allocation3], 1 }
 0xa24   :  { %1568 = vsyncpa [#allocation3 + $0x1], 1 }

</bundles_post_ra>
